<compile_context>
chip_gen: v7x
topology: tpu7x:2x2x1
jax: 0.10.0
libtpu: 0.0.40
codegen_flags: <defaults>
</compile_context>

<pallas_src>
import math

import jax
import jax.numpy as jnp
from jax.experimental import pallas as pl
from jax.experimental.pallas import tpu as pltpu


def _ite_kernel(c_ref, f1_ref, f2_ref, o_ref):
    # All refs are (tm, lane) VMEM tiles in the inputs' native dtype.
    # Upcast in-register (no-op for f32), blend, cast back.
    c = c_ref[...].astype(jnp.float32)
    f1 = f1_ref[...].astype(jnp.float32)
    f2 = f2_ref[...].astype(jnp.float32)
    # f1*c + f2*(1-c)  ==  f2 + c*(f1 - f2): 3 VALU ops, one fewer live vreg.
    o_ref[...] = (f2 + c * (f1 - f2)).astype(o_ref.dtype)


def _round_up(x, m):
    return ((x + m - 1) // m) * m


def ite_pallas(c, f1, f2, *, block_bytes=2 * 1024 * 1024, min_pallas_elems=65536):
    """f1 * c + f2 * (1 - c) computed in a Pallas TPU kernel.

    Handles any matching input shape/dtype.  Lane-dense zero-copy path when the
    total element count is a multiple of 128; pad fallback otherwise.
    """
    orig_shape = c.shape
    assert f1.shape == orig_shape and f2.shape == orig_shape, "shape mismatch"

    out_dtype = jnp.result_type(c.dtype, f1.dtype, f2.dtype)
    c = jnp.asarray(c, out_dtype)
    f1 = jnp.asarray(f1, out_dtype)
    f2 = jnp.asarray(f2, out_dtype)

    total = math.prod(orig_shape) if orig_shape else 1

    # Small-input fast path: launch + layout plumbing dominates below ~64K
    # elements; XLA's fused elementwise is strictly faster there.
    if total < min_pallas_elems:
        return (f2 + c * (f1 - f2)).astype(out_dtype)

    cf = c.reshape(-1)
    f1f = f1.reshape(-1)
    f2f = f2.reshape(-1)

    # Only genuinely ragged totals pay a pad copy (at most 127 elements of
    # padding); the module's natural (n, 128) layouts take the zero-copy path.
    padded_total = _round_up(total, 128)
    pad = padded_total - total
    if pad:
        cf = jnp.pad(cf, (0, pad))
        f1f = jnp.pad(f1f, (0, pad))
        f2f = jnp.pad(f2f, (0, pad))

    # Widest lane-dense 2-D view whose lane count divides the element count
    # -> unmasked full-width vst, contiguous DMA, no divisibility asserts.
    lane = 128
    for cand in (4096, 2048, 1024, 512, 256):
        if padded_total % cand == 0:
            lane = cand
            break
    rows = padded_total // lane

    itemsize = jnp.dtype(out_dtype).itemsize
    # Minimum sublane tile: (8,128) for 32-bit, (16,128) for bf16, (32,128) int8.
    min_rows = max(8, 32 // max(1, itemsize))

    # Target ~block_bytes per operand per step (16 MiB double-buffered across
    # 3 inputs + 1 output at the 2 MiB default -- fits every generation).
    target_rows = max(min_rows,
                      (block_bytes // (lane * itemsize)) // min_rows * min_rows)
    tm = min(target_rows, _round_up(rows, min_rows))
    # Prefer >= 2 grid steps once there is enough data: v7x has 2 TensorCores,
    # a 1-step grid leaves half the chip idle.  (Ragged last block is fine --
    # only block_shape needs (8,128) alignment; Pallas masks the tail.)
    if rows >= 2 * min_rows:
        tm = min(tm, _round_up(pl.cdiv(rows, 2), min_rows))
    grid_m = pl.cdiv(rows, tm)

    c2 = cf.reshape(rows, lane)
    f12 = f1f.reshape(rows, lane)
    f22 = f2f.reshape(rows, lane)

    spec = pl.BlockSpec((tm, lane), lambda i: (i, 0))

    out2 = pl.pallas_call(
        _ite_kernel,
        out_shape=jax.ShapeDtypeStruct((rows, lane), out_dtype),
        grid_spec=pltpu.PrefetchScalarGridSpec(
            num_scalar_prefetch=0,
            grid=(grid_m,),
            in_specs=[spec, spec, spec],
            out_specs=spec,
        ),
        compiler_params=pltpu.CompilerParams(
            dimension_semantics=("parallel",),
            # Explicit limit so the 2 MiB-per-operand tile also clears v5e's
            # 16 MiB scoped default; footprint stays <= ~16 MiB everywhere.
            vmem_limit_bytes=32 * 1024 * 1024,
        ),
        cost_estimate=pl.CostEstimate(
            flops=3 * padded_total,
            transcendentals=0,
            bytes_accessed=4 * padded_total * itemsize,
        ),
    )(c2, f12, f22)

    out = out2.reshape(-1)
    if pad:
        out = out[:total]
    return out.reshape(orig_shape)


def ite_ref(c, f1, f2):
    c = jnp.asarray(c, jnp.float32)
    f1 = jnp.asarray(f1, jnp.float32)
    f2 = jnp.asarray(f2, jnp.float32)
    return f1 * c + f2 * (1.0 - c)


if __name__ == "__main__":
    # TODO(synk): evaluation of the sub-expressions self.c / self.f1 / self.f2
    # (and .retain_grad / to_z3) is caller-side glue, not part of this kernel.
    key = jax.random.PRNGKey(0)
    kc, k1, k2 = jax.random.split(key, 3)

    # 1) natural module shape (n_samples=8, n_features=128), forced through
    #    the Pallas path (zero-copy lane-dense view, no pad).
    shape = (8, 128)
    c = jax.nn.sigmoid(jax.random.normal(kc, shape, dtype=jnp.float32))
    f1 = jax.random.normal(k1, shape, dtype=jnp.float32)
    f2 = jax.random.normal(k2, shape, dtype=jnp.float32)
    out = jax.block_until_ready(ite_pallas(c, f1, f2, min_pallas_elems=0))
    ref = ite_ref(c, f1, f2)
    assert out.shape == ref.shape and out.dtype == ref.dtype
    assert jnp.max(jnp.abs(out - ref)) < 1e-5

    # 2) larger shape that takes the Pallas path by default (grid >= 2 steps).
    shape_big = (1024, 128)
    c_g = jax.nn.sigmoid(jax.random.normal(kc, shape_big, dtype=jnp.float32))
    f1_g = jax.random.normal(k1, shape_big, dtype=jnp.float32)
    f2_g = jax.random.normal(k2, shape_big, dtype=jnp.float32)
    out_g = jax.block_until_ready(ite_pallas(c_g, f1_g, f2_g))
    assert jnp.max(jnp.abs(out_g - ite_ref(c_g, f1_g, f2_g))) < 1e-5

    # 3) ragged, non-128-divisible shape -> pad fallback, forced through Pallas.
    shape_odd = (7, 33)
    c_b = jax.nn.sigmoid(jax.random.normal(kc, shape_odd, dtype=jnp.float32))
    f1_b = jax.random.normal(k1, shape_odd, dtype=jnp.float32)
    f2_b = jax.random.normal(k2, shape_odd, dtype=jnp.float32)
    out_b = jax.block_until_ready(ite_pallas(c_b, f1_b, f2_b, min_pallas_elems=0))
    assert jnp.max(jnp.abs(out_b - ite_ref(c_b, f1_b, f2_b))) < 1e-5

    # 4) bf16 I/O stays bf16 on the wire (half the HBM bytes), f32 in-register.
    c_h = jax.nn.sigmoid(jax.random.normal(kc, shape_big, dtype=jnp.bfloat16))
    f1_h = jax.random.normal(k1, shape_big, dtype=jnp.bfloat16)
    f2_h = jax.random.normal(k2, shape_big, dtype=jnp.bfloat16)
    out_h = jax.block_until_ready(ite_pallas(c_h, f1_h, f2_h))
    assert out_h.dtype == jnp.bfloat16 and out_h.shape == shape_big
    assert jnp.max(jnp.abs(out_h.astype(jnp.float32)
                           - ite_ref(c_h, f1_h, f2_h))) < 5e-2

    print("KERNEL_OK")
</pallas_src>

<mosaic_0001>
module attributes {stable_mosaic.version = 11 : i64} {
  func.func @_ite_kernel(%arg0: i32, %arg1: memref<8x1024xf32, #tpu.memory_space<vmem>>, %arg2: memref<8x1024xf32, #tpu.memory_space<vmem>>, %arg3: memref<8x1024xf32, #tpu.memory_space<vmem>>, %arg4: memref<8x1024xf32, #tpu.memory_space<vmem>>) attributes {dimension_semantics = [#tpu.dimension_semantics<parallel>], iteration_bounds = array<i64: 1>, scalar_prefetch = 0 : i64, scratch_operands = 0 : i64, tpu.core_type = #tpu.core_type<tc>, window_params = [{transform_indices = @transform_0, window_bounds = array<i64: 8, 1024>}, {transform_indices = @transform_1, window_bounds = array<i64: 8, 1024>}, {transform_indices = @transform_2, window_bounds = array<i64: 8, 1024>}, {transform_indices = @transform_3, window_bounds = array<i64: 8, 1024>}]} {
    %c0 = arith.constant 0 : index
    %c0_0 = arith.constant 0 : index
    %0 = vector.load %arg1[%c0, %c0_0] : memref<8x1024xf32, #tpu.memory_space<vmem>>, vector<8x1024xf32>
    %c0_1 = arith.constant 0 : index
    %c0_2 = arith.constant 0 : index
    %1 = vector.load %arg2[%c0_1, %c0_2] : memref<8x1024xf32, #tpu.memory_space<vmem>>, vector<8x1024xf32>
    %c0_3 = arith.constant 0 : index
    %c0_4 = arith.constant 0 : index
    %2 = vector.load %arg3[%c0_3, %c0_4] : memref<8x1024xf32, #tpu.memory_space<vmem>>, vector<8x1024xf32>
    %3 = arith.subf %1, %2 : vector<8x1024xf32>
    %4 = arith.mulf %0, %3 : vector<8x1024xf32>
    %5 = arith.addf %2, %4 : vector<8x1024xf32>
    %c0_5 = arith.constant 0 : index
    %c0_6 = arith.constant 0 : index
    %6 = vector.load %arg4[%c0_5, %c0_6] : memref<8x1024xf32, #tpu.memory_space<vmem>>, vector<8x1024xf32>
    tpu.vector_store %arg4[%c0_5, %c0_6], %5 {strides = array<i32>} : memref<8x1024xf32, #tpu.memory_space<vmem>>, vector<8x1024xf32>,
    return
  }
  func.func @transform_0(%arg0: i32) -> (i32, i32) {
    %c0_i32 = arith.constant 0 : i32
    %c0_i32_0 = arith.constant 0 : i32
    return %arg0, %c0_i32 : i32, i32
  }
  func.func @transform_1(%arg0: i32) -> (i32, i32) {
    %c0_i32 = arith.constant 0 : i32
    %c0_i32_0 = arith.constant 0 : i32
    return %arg0, %c0_i32 : i32, i32
  }
  func.func @transform_2(%arg0: i32) -> (i32, i32) {
    %c0_i32 = arith.constant 0 : i32
    %c0_i32_0 = arith.constant 0 : i32
    return %arg0, %c0_i32 : i32, i32
  }
  func.func @transform_3(%arg0: i32) -> (i32, i32) {
    %c0_i32 = arith.constant 0 : i32
    %c0_i32_0 = arith.constant 0 : i32
    return %arg0, %c0_i32 : i32, i32
  }
}

</mosaic_0001>

<bundles_post_ra>
// kernel: tpu_custom_call.1
= control target key start
LH: loop header
LB: loop body
LE: loop exit
PB: predicated region body
PF: predicated region fallthrough
CT: control target
= control target key end

     0   :  { %8 = vsyncpa [#allocation3], 0  ;;  %s316_s0 = inlined_call_operand.hbm [shape: f32[1,1024], index: 0, kind: input, shape index: {}]   ;;  %s317_s1 = inlined_call_operand.hbm [shape: f32[1,1024], index: 1, kind: input, shape index: {}]   ;;  %s318_s2 = inlined_call_operand.hbm [shape: f32[1,1024], index: 2, kind: input, shape index: {}]   ;;  %s319_s3 = inlined_call_operand.hbm [shape: f32[1,1024], index: 3, kind: output, shape index: {}]  }
   0x1   :  { %9 = vsyncpa [#allocation6], 0 }
   0x2   :  { %10 = vsyncpa [#allocation4], 0 }
   0x3   :  { %15 = vsyncadd [#allocation3], 896  ;;  %s230_s12 = smov [#allocation2]   ;;  %s136_s16 = scalar_lea.hbm %s316_s0, 128 }
   0x4   :  { %s16_s13 = sshll.u32 %s230_s12, 4  ;;  %p137_p0 = scmp.ne.s32.totalorder %s316_s0, %s136_s16  ;;  %s17_s13 = int_to_ptr.vmem [resolvable:$true] %s16_s13 }
   0x5   :  { %p140_p1 = scmp.lt.u32.totalorder %s136_s16, %s316_s0 }
   0x7   :  { %p142_p2 = pnand %p140_p1, %p137_p0 }
   0x9   :  { %145 = shalt.err (!%p142_p2)
}
   0xa   :  { %s146_s21 = scalar_lea.vmem %s17_s13, 128  ;;  %s150_s22 = scalar_lea.vmem %s17_s13, 1024 }
   0xb   :  { %p147_p3 = scmp.ne.s32.totalorder %s17_s13, %s146_s21  ;;  %p151_p4 = scmp.lt.s32.totalorder %s17_s13, %s17_s13 }
   0xc   :  { %p152_p5 = scmp.lt.s32.totalorder %s150_s22, %s146_s21 }
   0xe   :  { %p153_p6 = por %p152_p5, %p151_p4 }
  0x10   :  { %p154_p7 = pnand %p153_p6, %p147_p3 }
  0x12   :  { %157 = shalt.err (!%p154_p7)
}
  0x13   :  { %s231_s23 = smov 128   ;;  %s232_s24 = smov 8  }
  0x14   :  { %22 = dma.hbm_to_vmem [thread:$0]  %s316_s0, 128, %s17_s13, [#allocation3], %s231_s23, %s231_s23, %s232_s24  }
  0x15   :  { %27 = vsyncadd [#allocation6], 896  ;;  %s233_s27 = smov [#allocation5]   ;;  %s158_s4 = scalar_lea.hbm %s317_s1, 128 }
  0x16   :  { %s28_s28 = sshll.u32 %s233_s27, 4  ;;  %p159_p8 = scmp.ne.s32.totalorder %s317_s1, %s158_s4  ;;  %s29_s28 = int_to_ptr.vmem [resolvable:$true] %s28_s28 }
  0x17   :  { %p162_p9 = scmp.lt.u32.totalorder %s158_s4, %s317_s1 }
  0x19   :  { %p164_p10 = pnand %p162_p9, %p159_p8 }
  0x1b   :  { %167 = shalt.err (!%p164_p10)
}
  0x1c   :  { %s168_s9 = scalar_lea.vmem %s29_s28, 128  ;;  %s172_s0 = scalar_lea.vmem %s29_s28, 1024 }
  0x1d   :  { %p169_p11 = scmp.ne.s32.totalorder %s29_s28, %s168_s9  ;;  %p173_p12 = scmp.lt.s32.totalorder %s29_s28, %s29_s28 }
  0x1e   :  { %p174_p13 = scmp.lt.s32.totalorder %s172_s0, %s168_s9 }
  0x20   :  { %p175_p0 = por %p174_p13, %p173_p12 }
  0x22   :  { %p176_p1 = pnand %p175_p0, %p169_p11 }
  0x24   :  { %179 = shalt.err (!%p176_p1)
}
  0x25   :  { %34 = dma.hbm_to_vmem [thread:$0]  %s317_s1, 128, %s29_s28, [#allocation6], %s231_s23, %s231_s23, %s232_s24  }
  0x26   :  { %39 = vsyncadd [#allocation6], 896  ;;  %s234_s12 = smov [#allocation7]   ;;  %s180_s16 = scalar_lea.hbm %s318_s2, 128 }
  0x27   :  { %s40_s13 = sshll.u32 %s234_s12, 4  ;;  %p181_p2 = scmp.ne.s32.totalorder %s318_s2, %s180_s16  ;;  %s41_s13 = int_to_ptr.vmem [resolvable:$true] %s40_s13 }
  0x28   :  { %p184_p3 = scmp.lt.u32.totalorder %s180_s16, %s318_s2 }
  0x2a   :  { %p186_p4 = pnand %p184_p3, %p181_p2 }
  0x2c   :  { %189 = shalt.err (!%p186_p4)
}
  0x2d   :  { %s190_s21 = scalar_lea.vmem %s41_s13, 128  ;;  %s194_s1 = scalar_lea.vmem %s41_s13, 1024 }
  0x2e   :  { %p191_p5 = scmp.ne.s32.totalorder %s41_s13, %s190_s21  ;;  %p195_p6 = scmp.lt.s32.totalorder %s41_s13, %s41_s13 }
  0x2f   :  { %p196_p7 = scmp.lt.s32.totalorder %s194_s1, %s190_s21 }
  0x31   :  { %p197_p8 = por %p196_p7, %p195_p6 }
  0x33   :  { %p198_p9 = pnand %p197_p8, %p191_p5 }
  0x35   :  { %201 = shalt.err (!%p198_p9)
}
  0x36   :  { %46 = dma.hbm_to_vmem [thread:$0]  %s318_s2, 128, %s41_s13, [#allocation6], %s231_s23, %s231_s23, %s232_s24  }
  0x37   :  { %224 = dma.done.wait [#allocation3], 1024  }
  0x38   :  { %225 = vsyncadd [#allocation3], 4294966272 }
  0x39   :  { %226 = dma.done.wait [#allocation6], 2048  }
  0x3a   :  { %227 = vsyncadd [#allocation6], 4294965248  ;;  %v56_v0 = vld [vmem:[#allocation2] sm:$0xff]  ;;  %v57_v4 = vld [vmem:[#allocation2 + $0x8] sm:$0xff] }
  0x3b   :  { %v64_v1 = vld [vmem:[#allocation5] sm:$0xff]  ;;  %v65_v5 = vld [vmem:[#allocation5 + $0x8] sm:$0xff]  ;;  %v58_v8 = vld [vmem:[#allocation2 + $0x10] sm:$0xff] }
  0x3c   :  { %v72_v2 = vld [vmem:[#allocation7] sm:$0xff]  ;;  %v73_v6 = vld [vmem:[#allocation7 + $0x8] sm:$0xff]  ;;  %v66_v9 = vld [vmem:[#allocation5 + $0x10] sm:$0xff] }
  0x3d   :  { %v80_v3 = vsub.f32 %v64_v1, %v72_v2  ;;  %v81_v7 = vsub.f32 %v65_v5, %v73_v6  ;;  %v74_v10 = vld [vmem:[#allocation7 + $0x10] sm:$0xff]  ;;  %v59_v13 = vld [vmem:[#allocation2 + $0x18] sm:$0xff]  ;;  %v60_v18 = vld [vmem:[#allocation2 + $0x20] sm:$0xff] }
  0x3e   :  { %v82_v12 = vsub.f32 %v66_v9, %v74_v10  ;;  %v67_v14 = vld [vmem:[#allocation5 + $0x18] sm:$0xff]  ;;  %v68_v19 = vld [vmem:[#allocation5 + $0x20] sm:$0xff]  ;;  %v61_v24 = vld [vmem:[#allocation2 + $0x28] sm:$0xff] }
  0x3f   :  { %v88_v11 = vmul.f32 %v80_v3, %v56_v0  ;;  %v75_v15 = vld [vmem:[#allocation7 + $0x18] sm:$0xff]  ;;  %v89_v16 = vmul.f32 %v81_v7, %v57_v4  ;;  %v76_v20 = vld [vmem:[#allocation7 + $0x20] sm:$0xff]  ;;  %v69_v25 = vld [vmem:[#allocation5 + $0x28] sm:$0xff] }
  0x40   :  { %v83_v17 = vsub.f32 %v67_v14, %v75_v15  ;;  %v90_v22 = vmul.f32 %v82_v12, %v58_v8  ;;  %v84_v23 = vsub.f32 %v68_v19, %v76_v20  ;;  %v77_v26 = vld [vmem:[#allocation7 + $0x28] sm:$0xff]  ;;  %v62_v30 = vld [vmem:[#allocation2 + $0x30] sm:$0xff]  ;;  %v63_v36 = vld [vmem:[#allocation2 + $0x38] sm:$0xff] }
  0x41   :  { %v96_v21 = vadd.f32 %v88_v11, %v72_v2  ;;  %v97_v27 = vadd.f32 %v89_v16, %v73_v6  ;;  %v85_v29 = vsub.f32 %v69_v25, %v77_v26  ;;  %v70_v31 = vld [vmem:[#allocation5 + $0x30] sm:$0xff]  ;;  %v71_v37 = vld [vmem:[#allocation5 + $0x38] sm:$0xff] }
  0x42   :  { %v91_v28 = vmul.f32 %v83_v17, %v59_v13  ;;  %v78_v32 = vld [vmem:[#allocation7 + $0x30] sm:$0xff]  ;;  %v98_v33 = vadd.f32 %v90_v22, %v74_v10  ;;  %v92_v34 = vmul.f32 %v84_v23, %v60_v18  ;;  %v79_v38 = vld [vmem:[#allocation7 + $0x38] sm:$0xff] }
  0x43   :  { %104 = vst [vmem:[#allocation8] sm:$0xff] %v96_v21  ;;  %v86_v35 = vsub.f32 %v70_v31, %v78_v32  ;;  %105 = vst [vmem:[#allocation8 + $0x8] sm:$0xff] %v97_v27  ;;  %v93_v40 = vmul.f32 %v85_v29, %v61_v24  ;;  %v87_v41 = vsub.f32 %v71_v37, %v79_v38 }
  0x44   :  { %v99_v39 = vadd.f32 %v91_v28, %v75_v15  ;;  %106 = vst [vmem:[#allocation8 + $0x10] sm:$0xff] %v98_v33  ;;  %v100_v42 = vadd.f32 %v92_v34, %v76_v20 }
  0x45   :  { %v94_v43 = vmul.f32 %v86_v35, %v62_v30  ;;  %v101_v44 = vadd.f32 %v93_v40, %v77_v26  ;;  %v95_v45 = vmul.f32 %v87_v41, %v63_v36 }
  0x46   :  { %107 = vst [vmem:[#allocation8 + $0x18] sm:$0xff] %v99_v39  ;;  %108 = vst [vmem:[#allocation8 + $0x20] sm:$0xff] %v100_v42 }
  0x47   :  { %v102_v46 = vadd.f32 %v94_v43, %v78_v32  ;;  %109 = vst [vmem:[#allocation8 + $0x28] sm:$0xff] %v101_v44  ;;  %v103_v47 = vadd.f32 %v95_v45, %v79_v38 }
  0x49   :  { %110 = vst [vmem:[#allocation8 + $0x30] sm:$0xff] %v102_v46  ;;  %111 = vst [vmem:[#allocation8 + $0x38] sm:$0xff] %v103_v47 }
  0x4a   :  { %116 = vsyncadd [#allocation4], 896  ;;  %s235_s2 = smov [#allocation8]  }
  0x4b   :  { %s117_s26 = sshll.u32 %s235_s2, 4  ;;  %s118_s26 = int_to_ptr.vmem [resolvable:$true] %s117_s26 }
  0x4c   :  { %s202_s27 = scalar_lea.vmem %s118_s26, 128  ;;  %s206_s28 = scalar_lea.vmem %s118_s26, 1024 }
  0x4d   :  { %p203_p10 = scmp.ne.s32.totalorder %s118_s26, %s202_s27  ;;  %p207_p11 = scmp.lt.s32.totalorder %s118_s26, %s118_s26 }
  0x4e   :  { %p208_p12 = scmp.lt.s32.totalorder %s206_s28, %s202_s27 }
  0x50   :  { %p209_p13 = por %p208_p12, %p207_p11 }
  0x52   :  { %p210_p0 = pnand %p209_p13, %p203_p10 }
  0x54   :  { %213 = shalt.err (!%p210_p0)
}
  0x55   :  { %s214_s4 = scalar_lea.hbm %s319_s3, 128 }
  0x56   :  { %p215_p1 = scmp.ne.s32.totalorder %s319_s3, %s214_s4  ;;  %p218_p2 = scmp.lt.u32.totalorder %s214_s4, %s319_s3 }
  0x58   :  { %p220_p3 = pnand %p218_p2, %p215_p1 }
  0x5a   :  { %223 = shalt.err (!%p220_p3)
}
  0x5b   :  { %123 = dma.vmem_to_hbm [thread:$0]  %s118_s26, 128, %s319_s3, [#allocation4], %s231_s23, %s231_s23, %s232_s24  }
  0x5c   :  { %228 = dma.done.wait [#allocation4], 1024  }
  0x5d   :  { %229 = vsyncadd [#allocation4], 4294966272 }
  0x5e   :  { %127 = vsyncpa [#allocation3], 1 }
  0x5f   :  { %128 = vsyncpa [#allocation6], 1 }
  0x60   :  { %129 = vsyncpa [#allocation4], 1 }

</bundles_post_ra>
